<compile_context>
chip_gen: v5e
topology: v5e:2x2
jax: 0.10.0
libtpu: 0.0.40
codegen_flags: <defaults>
</compile_context>

<pallas_src>
import jax
import jax.numpy as jnp
from jax.experimental import pallas as pl
from jax.experimental.pallas import tpu as pltpu

D_MODEL = 256          # backbone_out in the reference module
NUM_CLASSES = 4        # small synthetic num_classes
NUM_ANCHORS = 9        # AnchorGenerator: 3 sizes x 3 aspect ratios per location
PATCH = 4              # backbone patch-embed stride
K_IN = 3 * PATCH * PATCH   # 48 -- NOT padded to 128 anymore
HEAD_PAD = 128         # fused (cls | objectness) head width, lane-dense
LANE = 128
TM_MAX = 256           # patch-tile rows (sweep 256/512/1024 -> 256)
TR_MAX = 512           # WLLAD row tile (rows of 128 lanes)
VMEM_LIMIT = 32 * 1024 * 1024


def _round_up(x, m):
    return ((x + m - 1) // m) * m


def _cdiv(a, b):
    return -(-a // b)


# ----------------------------------------------------------------------------
# WLLAD: weighted low-light adaptive fusion / enhancement (elementwise kernels)
# TODO(synk): original WLLAD definition is unavailable; this is a deterministic
# synthetic surrogate (illumination-gated RGB/IR fusion) with the same I/O.
# ----------------------------------------------------------------------------
def _wllad_fuse_kernel(ab_ref, rgb_ref, ir_ref, out_ref):
    rgb = rgb_ref[...]                                  # (1, 3, TR, 128) f32
    ir = ir_ref[...]                                    # (1, 1, TR, 128) f32
    alpha = ab_ref[0, 0]
    beta = ab_ref[0, 1]
    lum = jnp.mean(rgb, axis=1, keepdims=True)          # illumination map
    gate = jax.nn.sigmoid(alpha * lum + beta)           # EUP
    out_ref[...] = gate * rgb + (1.0 - gate) * ir       # broadcast IR over RGB


def _wllad_enhance_kernel(ab_ref, rgb_ref, out_ref):
    rgb = rgb_ref[...]                                  # (1, 3, TR, 128) f32
    alpha = ab_ref[0, 0]
    beta = ab_ref[0, 1]
    lum = jnp.mean(rgb, axis=1, keepdims=True)
    gate = jax.nn.sigmoid(alpha * lum + beta)
    out_ref[...] = rgb * (1.0 + gate)                   # adaptive low-light gain


def _wllad_call(kernel, inputs, ab, out_channels):
    """Run a WLLAD kernel on a lane-dense (B, C, rows, 128) pixel view."""
    B, _, H, W = inputs[0].shape
    hw = H * W
    r = _cdiv(hw, LANE)
    if r <= TR_MAX:
        tr, r_pad = r, r                 # full-dim block: no pad, no tail slice
    else:
        tr = TR_MAX
        r_pad = _round_up(r, tr)
    pad = r_pad * LANE - hw

    flats = []
    for x in inputs:
        c = x.shape[1]
        xf = x.reshape(B, c, hw)                         # contiguous -> free reshape
        if pad:
            xf = jnp.pad(xf, ((0, 0), (0, 0), (0, pad)))
        flats.append(xf.reshape(B, c, r_pad, LANE))

    in_specs = [pl.BlockSpec(memory_space=pltpu.MemorySpace.SMEM)] + [
        pl.BlockSpec((1, x.shape[1], tr, LANE), lambda b, i: (b, 0, i, 0))
        for x in flats
    ]
    out = pl.pallas_call(
        kernel,
        out_shape=jax.ShapeDtypeStruct((B, out_channels, r_pad, LANE), jnp.float32),
        grid=(B, r_pad // tr),
        in_specs=in_specs,
        out_specs=pl.BlockSpec((1, out_channels, tr, LANE),
                               lambda b, i: (b, 0, i, 0)),
        compiler_params=pltpu.CompilerParams(
            dimension_semantics=("parallel", "parallel"),
            vmem_limit_bytes=VMEM_LIMIT),
    )(ab, *flats)

    fused = out.reshape(B, out_channels, r_pad * LANE)
    if pad:
        fused = fused[:, :, :hw]
    return fused.reshape(B, out_channels, H, W)


# ----------------------------------------------------------------------------
# Hybrid backbone (patch embed -> GELU -> channel mix) + fused RPN/class head.
# One Pallas kernel, gridded over patch-tiles; weights resident in VMEM.
# ----------------------------------------------------------------------------
def _backbone_head_kernel(x_ref, w1_ref, b1_ref, w2_ref, b2_ref,
                          wh_ref, bh_ref, feat_ref, head_ref):
    x = x_ref[...]                                                    # (TM, 48) bf16
    h = jnp.dot(x, w1_ref[...], preferred_element_type=jnp.float32) + b1_ref[...]
    # tanh-approx GELU keeps the transcendental on the EUP slot; the reference
    # backbone internals are undefined, so exact-erf parity is not required.
    h = jax.nn.gelu(h)                                                # (TM, 256) f32
    f = jnp.dot(h.astype(jnp.bfloat16), w2_ref[...],
                preferred_element_type=jnp.float32) + b2_ref[...]
    fb = f.astype(jnp.bfloat16)
    feat_ref[...] = fb                                                # bf16 writeback
    # fused (cls | objectness) head: one lane-dense 128-wide matmul + store.
    hd = jnp.dot(fb, wh_ref[...], preferred_element_type=jnp.float32) + bh_ref[...]
    head_ref[...] = hd.astype(jnp.bfloat16)                           # bf16 writeback


def backbone_and_heads(patches, params):
    # patches: (P_total, 48) bf16 -- batch is folded into the patch axis.
    p_total = patches.shape[0]
    if p_total <= 16:
        tm = _round_up(p_total, 8)
    else:
        # cap the tile AND guarantee >= 2 grid steps (v7x 2nd TensorCore).
        tm = min(TM_MAX, _round_up(_cdiv(p_total, 2), 8))
    p_pad = _round_up(p_total, tm)
    if p_pad != p_total:
        patches = jnp.pad(patches, ((0, p_pad - p_total), (0, 0)))

    d_in = patches.shape[1]
    flops = 2 * p_pad * (d_in * D_MODEL + D_MODEL * D_MODEL + D_MODEL * HEAD_PAD)
    bytes_accessed = (
        2 * (p_pad * (d_in + D_MODEL + HEAD_PAD)                      # bf16 acts
             + d_in * D_MODEL + D_MODEL * D_MODEL + D_MODEL * HEAD_PAD)  # bf16 W
        + 4 * (2 * D_MODEL + HEAD_PAD))                               # f32 biases
    cost = pl.CostEstimate(flops=flops, transcendentals=p_pad * D_MODEL,
                           bytes_accessed=bytes_accessed)

    feats, head = pl.pallas_call(
        _backbone_head_kernel,
        out_shape=(
            jax.ShapeDtypeStruct((p_pad, D_MODEL), jnp.bfloat16),     # features
            jax.ShapeDtypeStruct((p_pad, HEAD_PAD), jnp.bfloat16),    # fused logits
        ),
        grid=(p_pad // tm,),
        in_specs=[
            pl.BlockSpec((tm, d_in), lambda i: (i, 0)),               # patch tile
            pl.BlockSpec((d_in, D_MODEL), lambda i: (0, 0)),          # w1 (resident)
            pl.BlockSpec((1, D_MODEL), lambda i: (0, 0)),             # b1
            pl.BlockSpec((D_MODEL, D_MODEL), lambda i: (0, 0)),       # w2
            pl.BlockSpec((1, D_MODEL), lambda i: (0, 0)),             # b2
            pl.BlockSpec((D_MODEL, HEAD_PAD), lambda i: (0, 0)),      # fused head W
            pl.BlockSpec((1, HEAD_PAD), lambda i: (0, 0)),            # fused head b
        ],
        out_specs=(
            pl.BlockSpec((tm, D_MODEL), lambda i: (i, 0)),
            pl.BlockSpec((tm, HEAD_PAD), lambda i: (i, 0)),
        ),
        compiler_params=pltpu.CompilerParams(
            dimension_semantics=("parallel",),
            vmem_limit_bytes=VMEM_LIMIT),
        cost_estimate=cost,
    )(patches, params["w1"], params["b1"], params["w2"], params["b2"],
      params["whead"], params["bhead"])

    feats = feats[:p_total]
    cls_logits = head[:p_total, :NUM_CLASSES].astype(jnp.float32)
    obj_logits = head[:p_total,
                      NUM_CLASSES:NUM_CLASSES + NUM_ANCHORS].astype(jnp.float32)
    return feats, cls_logits, obj_logits


# ----------------------------------------------------------------------------
# Glue: patchify (plain JAX under jit), parameter init, full Detector forward
# ----------------------------------------------------------------------------
def patchify(imgs, patch=PATCH):
    # imgs: (B, 3, H, W) f32 -> (B*P, 48) bf16, patch-major, no K padding.
    # TODO(synk): fully fusing this rearrange into the WLLAD kernel would save
    # one more HBM round trip, but needs an in-kernel (C,p,p)->lane relayout
    # that Mosaic handles unreliably at these tiny minor dims.
    B, C, H, W = imgs.shape
    assert H % patch == 0 and W % patch == 0, "pad inputs to a multiple of PATCH"
    hp, wp = H // patch, W // patch
    x = imgs.reshape(B, C, hp, patch, wp, patch)
    x = jnp.transpose(x, (0, 2, 4, 1, 3, 5))              # (B, hp, wp, C, p, p)
    x = x.reshape(B * hp * wp, C * patch * patch)         # (B*P, 48)
    return x.astype(jnp.bfloat16)


def init_params(key):
    keys = jax.random.split(key, 4)
    s = 0.02
    w1 = s * jax.random.normal(keys[0], (K_IN, D_MODEL), jnp.float32)
    w2 = s * jax.random.normal(keys[1], (D_MODEL, D_MODEL), jnp.float32)
    wc = s * jax.random.normal(keys[2], (D_MODEL, NUM_CLASSES), jnp.float32)
    wo = s * jax.random.normal(keys[3], (D_MODEL, NUM_ANCHORS), jnp.float32)
    whead = jnp.pad(jnp.concatenate([wc, wo], axis=1),
                    ((0, 0), (0, HEAD_PAD - NUM_CLASSES - NUM_ANCHORS)))
    return {
        "wllad_ab": jnp.array([[1.5, -0.25]], dtype=jnp.float32),     # (1, 2) SMEM
        "w1": w1.astype(jnp.bfloat16),
        "b1": jnp.zeros((1, D_MODEL), jnp.float32),
        "w2": w2.astype(jnp.bfloat16),
        "b2": jnp.zeros((1, D_MODEL), jnp.float32),
        "whead": whead.astype(jnp.bfloat16),
        "bhead": jnp.zeros((1, HEAD_PAD), jnp.float32),
    }


def _finish(fused, params, B, H, W):
    feats, cls_logits, obj_logits = backbone_and_heads(patchify(fused), params)
    P = (H // PATCH) * (W // PATCH)
    return {
        "fused_image": fused,
        "backbone_features": feats.reshape(B, P, D_MODEL),
        "class_logits": cls_logits.reshape(B, P, NUM_CLASSES),
        "rpn_objectness": obj_logits.reshape(B, P, NUM_ANCHORS),
    }


@jax.jit
def _forward_rgbt(imgs, params):
    B, _, H, W = imgs.shape
    rgb, ir = imgs[:, :3], imgs[:, 3:4]
    fused = _wllad_call(_wllad_fuse_kernel, [rgb, ir], params["wllad_ab"], 3)
    return _finish(fused, params, B, H, W)


@jax.jit
def _forward_rgb(imgs, params):
    B, _, H, W = imgs.shape
    fused = _wllad_call(_wllad_enhance_kernel, [imgs], params["wllad_ab"], 3)
    return _finish(fused, params, B, H, W)


def detector_forward(images, params):
    """Mirror of Detector.forward: per-image WLLAD fusion, then detection net.

    images: list of (C, H, W) f32 arrays with C in {3, 4} (channel 3 == IR).
    Same-shape images are batched into a single pallas pipeline; results are
    returned as per-image dicts in the original order.
    """
    groups = {}
    for idx, img in enumerate(images):
        groups.setdefault(tuple(int(d) for d in img.shape), []).append(idx)

    results = [None] * len(images)
    for shape, idxs in groups.items():
        batch = jnp.stack([images[i] for i in idxs], axis=0)          # (B, C, H, W)
        if shape[0] == 4:
            out = _forward_rgbt(batch, params)
        else:
            out = _forward_rgb(batch, params)
        # TODO(synk): torchvision FasterRCNN proposal generation, NMS and
        # RoIAlign / box-regression heads have no clean Pallas equivalent.
        # TODO(synk): AMSRP is constructed in __init__ but never used in
        # Detector.forward, so it is intentionally omitted.
        for j, i in enumerate(idxs):
            results[i] = {k: v[j] for k, v in out.items()}
    return results


if __name__ == "__main__":
    key = jax.random.PRNGKey(0)
    k_rgbt, k_rgb, k_params = jax.random.split(key, 3)

    # Small deterministic inputs: 2 RGBT (RGB + IR) images + 2 RGB images,
    # 32x32 spatial (H*W divisible by 128, multiple of PATCH -> no pad passes).
    imgs_rgbt = list(jax.random.uniform(k_rgbt, (2, 4, 32, 32), jnp.float32))
    imgs_rgb = list(jax.random.uniform(k_rgb, (2, 3, 32, 32), jnp.float32))
    params = init_params(k_params)

    out = detector_forward(imgs_rgbt + imgs_rgb, params)
    jax.block_until_ready(out)

    # light sanity checks on shapes / values
    P = (32 // PATCH) * (32 // PATCH)      # 64 patch locations per image
    assert len(out) == 4
    assert out[0]["fused_image"].shape == (3, 32, 32)
    assert out[0]["backbone_features"].shape == (P, D_MODEL)
    assert out[2]["class_logits"].shape == (P, NUM_CLASSES)
    assert out[3]["rpn_objectness"].shape == (P, NUM_ANCHORS)
    for o in out:
        for v in o.values():
            assert bool(jnp.all(jnp.isfinite(v.astype(jnp.float32))))

    print("KERNEL_OK")
</pallas_src>

<mosaic_0001>
module attributes {stable_mosaic.version = 11 : i64} {
  func.func @_wllad_fuse_kernel(%arg0: i32, %arg1: i32, %arg2: memref<1x2xf32, #tpu.memory_space<smem>>, %arg3: memref<1x3x8x128xf32, #tpu.memory_space<vmem>>, %arg4: memref<1x1x8x128xf32, #tpu.memory_space<vmem>>, %arg5: memref<1x3x8x128xf32, #tpu.memory_space<vmem>>) attributes {dimension_semantics = [#tpu.dimension_semantics<parallel>, #tpu.dimension_semantics<parallel>], iteration_bounds = array<i64: 2, 1>, scalar_prefetch = 0 : i64, scratch_operands = 0 : i64, tpu.core_type = #tpu.core_type<tc>, window_params = [{transform_indices = @transform_0, window_bounds = array<i64: 1, 2>}, {transform_indices = @transform_1, window_bounds = array<i64: 1, 3, 8, 128>}, {transform_indices = @transform_2, window_bounds = array<i64: 1, 1, 8, 128>}, {transform_indices = @transform_3, window_bounds = array<i64: 1, 3, 8, 128>}]} {
    %c0 = arith.constant 0 : index
    %c0_0 = arith.constant 0 : index
    %c0_1 = arith.constant 0 : index
    %c0_2 = arith.constant 0 : index
    %0 = vector.load %arg3[%c0, %c0_0, %c0_1, %c0_2] : memref<1x3x8x128xf32, #tpu.memory_space<vmem>>, vector<1x3x8x128xf32>
    %c0_3 = arith.constant 0 : index
    %c0_4 = arith.constant 0 : index
    %c0_5 = arith.constant 0 : index
    %c0_6 = arith.constant 0 : index
    %1 = vector.load %arg4[%c0_3, %c0_4, %c0_5, %c0_6] : memref<1x1x8x128xf32, #tpu.memory_space<vmem>>, vector<1x1x8x128xf32>
    %c0_7 = arith.constant 0 : index
    %c0_8 = arith.constant 0 : index
    %2 = memref.load %arg2[%c0_7, %c0_8] : memref<1x2xf32, #tpu.memory_space<smem>>
    %c0_9 = arith.constant 0 : index
    %c1 = arith.constant 1 : index
    %3 = memref.load %arg2[%c0_9, %c1] : memref<1x2xf32, #tpu.memory_space<smem>>
    %cst = arith.constant dense<0.000000e+00> : vector<1x8x128xf32>
    %4 = vector.multi_reduction <add>, %0, %cst [1] : vector<1x3x8x128xf32> to vector<1x8x128xf32>
    %5 = vector.shape_cast %4 : vector<1x8x128xf32> to vector<1x1x8x128xf32>
    %cst_10 = arith.constant 3.000000e+00 : f32
    %6 = vector.broadcast %cst_10 : f32 to vector<1x1x8x128xf32>
    %7 = arith.divf %5, %6 : vector<1x1x8x128xf32>
    %8 = vector.broadcast %2 : f32 to vector<1x1x8x128xf32>
    %9 = arith.mulf %8, %7 : vector<1x1x8x128xf32>
    %10 = vector.broadcast %3 : f32 to vector<1x1x8x128xf32>
    %11 = arith.addf %9, %10 : vector<1x1x8x128xf32>
    %12 = arith.negf %11 : vector<1x1x8x128xf32>
    %13 = math.exp %12 : vector<1x1x8x128xf32>
    %cst_11 = arith.constant 1.000000e+00 : f32
    %14 = vector.broadcast %cst_11 : f32 to vector<1x1x8x128xf32>
    %15 = arith.addf %14, %13 : vector<1x1x8x128xf32>
    %16 = arith.divf %14, %15 : vector<1x1x8x128xf32>
    %17 = vector.broadcast %16 : vector<1x1x8x128xf32> to vector<1x3x8x128xf32>
    %18 = arith.mulf %17, %0 : vector<1x3x8x128xf32>
    %cst_12 = arith.constant 1.000000e+00 : f32
    %19 = vector.broadcast %cst_12 : f32 to vector<1x1x8x128xf32>
    %20 = arith.subf %19, %16 : vector<1x1x8x128xf32>
    %21 = arith.mulf %20, %1 : vector<1x1x8x128xf32>
    %22 = vector.broadcast %21 : vector<1x1x8x128xf32> to vector<1x3x8x128xf32>
    %23 = arith.addf %18, %22 : vector<1x3x8x128xf32>
    %c0_13 = arith.constant 0 : index
    %c0_14 = arith.constant 0 : index
    %c0_15 = arith.constant 0 : index
    %c0_16 = arith.constant 0 : index
    %24 = vector.load %arg5[%c0_13, %c0_14, %c0_15, %c0_16] : memref<1x3x8x128xf32, #tpu.memory_space<vmem>>, vector<1x3x8x128xf32>
    tpu.vector_store %arg5[%c0_13, %c0_14, %c0_15, %c0_16], %23 {strides = array<i32>} : memref<1x3x8x128xf32, #tpu.memory_space<vmem>>, vector<1x3x8x128xf32>,
    return
  }
  func.func @transform_0(%arg0: i32, %arg1: i32) -> (i32, i32) {
    %c0_i32 = arith.constant 0 : i32
    %c0_i32_0 = arith.constant 0 : i32
    %c0_i32_1 = arith.constant 0 : i32
    return %c0_i32, %c0_i32_0 : i32, i32
  }
  func.func @transform_1(%arg0: i32, %arg1: i32) -> (i32, i32, i32, i32) {
    %c0_i32 = arith.constant 0 : i32
    %c0_i32_0 = arith.constant 0 : i32
    %c0_i32_1 = arith.constant 0 : i32
    return %arg0, %c0_i32, %arg1, %c0_i32_0 : i32, i32, i32, i32
  }
  func.func @transform_2(%arg0: i32, %arg1: i32) -> (i32, i32, i32, i32) {
    %c0_i32 = arith.constant 0 : i32
    %c0_i32_0 = arith.constant 0 : i32
    %c0_i32_1 = arith.constant 0 : i32
    return %arg0, %c0_i32, %arg1, %c0_i32_0 : i32, i32, i32, i32
  }
  func.func @transform_3(%arg0: i32, %arg1: i32) -> (i32, i32, i32, i32) {
    %c0_i32 = arith.constant 0 : i32
    %c0_i32_0 = arith.constant 0 : i32
    %c0_i32_1 = arith.constant 0 : i32
    return %arg0, %c0_i32, %arg1, %c0_i32_0 : i32, i32, i32, i32
  }
}

module attributes {stable_mosaic.version = 11 : i64} {
  func.func @_backbone_head_kernel(%arg0: i32, %arg1: memref<64x48xbf16, #tpu.memory_space<vmem>>, %arg2: memref<48x256xbf16, #tpu.memory_space<vmem>>, %arg3: memref<1x256xf32, #tpu.memory_space<vmem>>, %arg4: memref<256x256xbf16, #tpu.memory_space<vmem>>, %arg5: memref<1x256xf32, #tpu.memory_space<vmem>>, %arg6: memref<256x128xbf16, #tpu.memory_space<vmem>>, %arg7: memref<1x128xf32, #tpu.memory_space<vmem>>, %arg8: memref<64x256xbf16, #tpu.memory_space<vmem>>, %arg9: memref<64x128xbf16, #tpu.memory_space<vmem>>) attributes {dimension_semantics = [#tpu.dimension_semantics<parallel>], iteration_bounds = array<i64: 2>, scalar_prefetch = 0 : i64, scratch_operands = 0 : i64, tpu.core_type = #tpu.core_type<tc>, window_params = [{transform_indices = @transform_0, window_bounds = array<i64: 64, 48>}, {pipeline_mode = #tpu.pipeline_mode<synchronous>, transform_indices = @transform_1, window_bounds = array<i64: 48, 256>}, {pipeline_mode = #tpu.pipeline_mode<synchronous>, transform_indices = @transform_2, window_bounds = array<i64: 1, 256>}, {pipeline_mode = #tpu.pipeline_mode<synchronous>, transform_indices = @transform_3, window_bounds = array<i64: 256, 256>}, {pipeline_mode = #tpu.pipeline_mode<synchronous>, transform_indices = @transform_4, window_bounds = array<i64: 1, 256>}, {pipeline_mode = #tpu.pipeline_mode<synchronous>, transform_indices = @transform_5, window_bounds = array<i64: 256, 128>}, {pipeline_mode = #tpu.pipeline_mode<synchronous>, transform_indices = @transform_6, window_bounds = array<i64: 1, 128>}, {transform_indices = @transform_7, window_bounds = array<i64: 64, 256>}, {transform_indices = @transform_8, window_bounds = array<i64: 64, 128>}]} {
    %c0 = arith.constant 0 : index
    %c0_0 = arith.constant 0 : index
    %0 = vector.load %arg1[%c0, %c0_0] : memref<64x48xbf16, #tpu.memory_space<vmem>>, vector<64x48xbf16>
    %c0_1 = arith.constant 0 : index
    %c0_2 = arith.constant 0 : index
    %1 = vector.load %arg2[%c0_1, %c0_2] : memref<48x256xbf16, #tpu.memory_space<vmem>>, vector<48x256xbf16>
    %cst = arith.constant dense<0.000000e+00> : vector<64x256xf32>
    %2 = tpu.matmul %0, %1, %cst {dimension_numbers = #tpu.dot_dimension_numbers<[1], [0], [0], [1], [0, 0, 1, 1], [], []>} : vector<64x48xbf16>, vector<48x256xbf16>, vector<64x256xf32> -> vector<64x256xf32>
    %c0_3 = arith.constant 0 : index
    %c0_4 = arith.constant 0 : index
    %3 = vector.load %arg3[%c0_3, %c0_4] : memref<1x256xf32, #tpu.memory_space<vmem>>, vector<1x256xf32>
    %4 = vector.broadcast %3 : vector<1x256xf32> to vector<64x256xf32>
    %5 = arith.addf %2, %4 : vector<64x256xf32>
    %6 = arith.mulf %5, %5 : vector<64x256xf32>
    %7 = arith.mulf %5, %6 : vector<64x256xf32>
    %cst_5 = arith.constant 4.471500e-02 : f32
    %8 = vector.broadcast %cst_5 : f32 to vector<64x256xf32>
    %9 = arith.mulf %8, %7 : vector<64x256xf32>
    %10 = arith.addf %5, %9 : vector<64x256xf32>
    %cst_6 = arith.constant 0.797884583 : f32
    %11 = vector.broadcast %cst_6 : f32 to vector<64x256xf32>
    %12 = arith.mulf %11, %10 : vector<64x256xf32>
    %13 = math.tanh %12 : vector<64x256xf32>
    %cst_7 = arith.constant 1.000000e+00 : f32
    %14 = vector.broadcast %cst_7 : f32 to vector<64x256xf32>
    %15 = arith.addf %14, %13 : vector<64x256xf32>
    %cst_8 = arith.constant 5.000000e-01 : f32
    %16 = vector.broadcast %cst_8 : f32 to vector<64x256xf32>
    %17 = arith.mulf %16, %15 : vector<64x256xf32>
    %18 = arith.mulf %5, %17 : vector<64x256xf32>
    %19 = arith.truncf %18 : vector<64x256xf32> to vector<64x256xbf16>
    %c0_9 = arith.constant 0 : index
    %c0_10 = arith.constant 0 : index
    %20 = vector.load %arg4[%c0_9, %c0_10] : memref<256x256xbf16, #tpu.memory_space<vmem>>, vector<256x256xbf16>
    %cst_11 = arith.constant dense<0.000000e+00> : vector<64x256xf32>
    %21 = tpu.matmul %19, %20, %cst_11 {dimension_numbers = #tpu.dot_dimension_numbers<[1], [0], [0], [1], [0, 0, 1, 1], [], []>} : vector<64x256xbf16>, vector<256x256xbf16>, vector<64x256xf32> -> vector<64x256xf32>
    %c0_12 = arith.constant 0 : index
    %c0_13 = arith.constant 0 : index
    %22 = vector.load %arg5[%c0_12, %c0_13] : memref<1x256xf32, #tpu.memory_space<vmem>>, vector<1x256xf32>
    %23 = vector.broadcast %22 : vector<1x256xf32> to vector<64x256xf32>
    %24 = arith.addf %21, %23 : vector<64x256xf32>
    %25 = arith.truncf %24 : vector<64x256xf32> to vector<64x256xbf16>
    %c0_14 = arith.constant 0 : index
    %c0_15 = arith.constant 0 : index
    %26 = vector.load %arg8[%c0_14, %c0_15] : memref<64x256xbf16, #tpu.memory_space<vmem>>, vector<64x256xbf16>
    tpu.vector_store %arg8[%c0_14, %c0_15], %25 {strides = array<i32>} : memref<64x256xbf16, #tpu.memory_space<vmem>>, vector<64x256xbf16>,
    %c0_16 = arith.constant 0 : index
    %c0_17 = arith.constant 0 : index
    %27 = vector.load %arg6[%c0_16, %c0_17] : memref<256x128xbf16, #tpu.memory_space<vmem>>, vector<256x128xbf16>
    %cst_18 = arith.constant dense<0.000000e+00> : vector<64x128xf32>
    %28 = tpu.matmul %25, %27, %cst_18 {dimension_numbers = #tpu.dot_dimension_numbers<[1], [0], [0], [1], [0, 0, 1, 1], [], []>} : vector<64x256xbf16>, vector<256x128xbf16>, vector<64x128xf32> -> vector<64x128xf32>
    %c0_19 = arith.constant 0 : index
    %c0_20 = arith.constant 0 : index
    %29 = vector.load %arg7[%c0_19, %c0_20] : memref<1x128xf32, #tpu.memory_space<vmem>>, vector<1x128xf32>
    %30 = vector.broadcast %29 : vector<1x128xf32> to vector<64x128xf32>
    %31 = arith.addf %28, %30 : vector<64x128xf32>
    %32 = arith.truncf %31 : vector<64x128xf32> to vector<64x128xbf16>
    %c0_21 = arith.constant 0 : index
    %c0_22 = arith.constant 0 : index
    %33 = vector.load %arg9[%c0_21, %c0_22] : memref<64x128xbf16, #tpu.memory_space<vmem>>, vector<64x128xbf16>
    tpu.vector_store %arg9[%c0_21, %c0_22], %32 {strides = array<i32>} : memref<64x128xbf16, #tpu.memory_space<vmem>>, vector<64x128xbf16>,
    return
  }
  func.func @transform_0(%arg0: i32) -> (i32, i32) {
    %c0_i32 = arith.constant 0 : i32
    %c0_i32_0 = arith.constant 0 : i32
    return %arg0, %c0_i32 : i32, i32
  }
  func.func @transform_1(%arg0: i32) -> (i32, i32) {
    %c0_i32 = arith.constant 0 : i32
    %c0_i32_0 = arith.constant 0 : i32
    %c0_i32_1 = arith.constant 0 : i32
    return %c0_i32, %c0_i32_0 : i32, i32
  }
  func.func @transform_2(%arg0: i32) -> (i32, i32) {
    %c0_i32 = arith.constant 0 : i32
    %c0_i32_0 = arith.constant 0 : i32
    %c0_i32_1 = arith.constant 0 : i32
    return %c0_i32, %c0_i32_0 : i32, i32
  }
  func.func @transform_3(%arg0: i32) -> (i32, i32) {
    %c0_i32 = arith.constant 0 : i32
    %c0_i32_0 = arith.constant 0 : i32
    %c0_i32_1 = arith.constant 0 : i32
    return %c0_i32, %c0_i32_0 : i32, i32
  }
  func.func @transform_4(%arg0: i32) -> (i32, i32) {
    %c0_i32 = arith.constant 0 : i32
    %c0_i32_0 = arith.constant 0 : i32
    %c0_i32_1 = arith.constant 0 : i32
    return %c0_i32, %c0_i32_0 : i32, i32
  }
  func.func @transform_5(%arg0: i32) -> (i32, i32) {
    %c0_i32 = arith.constant 0 : i32
    %c0_i32_0 = arith.constant 0 : i32
    %c0_i32_1 = arith.constant 0 : i32
    return %c0_i32, %c0_i32_0 : i32, i32
  }
  func.func @transform_6(%arg0: i32) -> (i32, i32) {
    %c0_i32 = arith.constant 0 : i32
    %c0_i32_0 = arith.constant 0 : i32
    %c0_i32_1 = arith.constant 0 : i32
    return %c0_i32, %c0_i32_0 : i32, i32
  }
  func.func @transform_7(%arg0: i32) -> (i32, i32) {
    %c0_i32 = arith.constant 0 : i32
    %c0_i32_0 = arith.constant 0 : i32
    return %arg0, %c0_i32 : i32, i32
  }
  func.func @transform_8(%arg0: i32) -> (i32, i32) {
    %c0_i32 = arith.constant 0 : i32
    %c0_i32_0 = arith.constant 0 : i32
    return %arg0, %c0_i32 : i32, i32
  }
}

</mosaic_0001>

<bundles_post_ra>
// kernel: _forward_rgbt.2
= control target key start
LH: loop header
LB: loop body
LE: loop exit
PB: predicated region body
PF: predicated region fallthrough
CT: control target
= control target key end

     0   :  { %8 = vsyncpa [#allocation3], 0  ;;  %s527_s12 = smov 0   ;;  %s529_s13 = smov 0   ;;  %s575_s0 = inlined_call_operand.vmem [shape: f32[1,2], index: 0, kind: input, shape index: {}]   ;;  %s576_s1 = inlined_call_operand.vmem [shape: f32[2,3,8,128], index: 1, kind: input, shape index: {}]   ;;  %s577_s2 = inlined_call_operand.vmem [shape: f32[2,1,8,128], index: 2, kind: input, shape index: {}]   ;;  %s578_s3 = inlined_call_operand.vmem [shape: f32[2,3,8,128], index: 3, kind: output, shape index: {}]  }
   0x1   :  { %s531_s14 = smov 0  }
   0x2 LB: > { %s405_s15 = sadd.s32 4294967295, %s503_s14   ;;  %s26_s16 = sadd.s32 1, %s499_s13  ;;  %s503_s14 = sphi %s531_s14, %s14_s14   ;;  %s499_s13 = sphi %s529_s13, %s580_s13   ;;  %s495_s12 = sphi %s527_s12, %s579_s12  }
   0x3   : > { %p28_p0 = scmp.ge.s32.totalorder %s26_s16, 2  ;;  %p407_p1 = scmp.ge.s32.totalorder %s503_s14, 1 }
   0x4   : > { %p136_p2 = scmp.lt.s32.totalorder %s503_s14, 3  ;;  %p428_p4 = scmp.eq.s32.totalorder %s405_s15, 0 }
   0x5   : > { %s582_s16 = smov (%p28_p0, %s26_s16), 0  ;;  %s148_s19 = sshll.u32 %s575_s0, 4  ;;  %s149_s19 = int_to_ptr.vmem [resolvable:$true] %s148_s19 }
   0x6   : > { %p137_p3 = pnand %p407_p1, %p136_p2  ;;  %s505_s20 = smov [#allocation2]  }
   0x8   : > { %p424_p5 = pneg %p137_p3  ;;  %182 = sbr.rel (%p137_p3) target bundleno = 76 (0x4c), region = 32 }
   0xa   : > { %p425_p6 = pnand %p428_p4, %p424_p5 }
   0xc   : > { %427 = dma.vmem_to_smem (!%p425_p6), %s149_s19, 16, %s505_s20, [#allocation3]  }
   0xd   : > { %490 = dma.done.wait (%p428_p4), [#allocation3], 16  }
   0xe   : > { %492 = vsyncadd (%p428_p4), [#allocation3], 4294967280 }
   0xf   : > { %189 = sfence }
  0x10   : > { %p221_p7 = scmp.lt.s32.totalorder %s495_s12, 1  ;;  %v506_v0 = vmov 3.0   ;;  %s248_s25 = sld [smem:[#allocation2]] }
  0x11   : > { %456 = vrcp.f32 %v506_v0  ;;  %s415_s26 = sld [smem:[#allocation2 + $0x1]] }
  0x12   : > { %s584_s12 = smov (!%p221_p7, %s495_s12), 1 }
  0x13   : > { %s419_s21 = smul.u32 24, %s584_s12  ;;  %s413_s27 = sshll.u32 %s584_s12, 3 }
  0x14   : > { %s235_s30 = scalar_lea.vmem %s577_s2, %s413_s27 }
  0x15   : > { %s228_s24 = scalar_lea.vmem %s576_s1, %s419_s21  ;;  %v247_v29 = vld [vmem:[%s235_s30] sm:$0xff]  ;;  %s243_s6 = scalar_lea.vmem %s578_s3, %s419_s21 }
  0x16   : > { %v244_v2 = vld [vmem:[%s228_s24] sm:$0xff]  ;;  %v245_v3 = vld [vmem:[%s228_s24 + $0x8] sm:$0xff]  ;;  %v246_v6 = vld [vmem:[%s228_s24 + $0x10] sm:$0xff]  ;;  %v260_v12 = vstv %s248_s25 }
  0x17   : > { %v457_v1 = vpop.eup %456  ;;  %v250_v5 = vadd.f32 %v245_v3, %v244_v2  ;;  %v262_v14 = vstv %s415_s26 }
  0x18   : > { %v253_v4 = vmul.f32 3.0, %v457_v1  ;;  %vm257_vm0 = vweird.f32 %v457_v1 }
  0x19   : > { %v251_v9 = vadd.f32 %v250_v5, %v246_v6 }
  0x1a   : > { %v254_v7 = vsub.f32 1.0, %v253_v4 }
  0x1c   : > { %v255_v8 = vmul.f32 %v457_v1, %v254_v7 }
  0x1e   : > { %v256_v10 = vadd.f32 %v457_v1, %v255_v8 }
  0x20   : > { %v258_v11 = vsel %vm257_vm0, %v457_v1, %v256_v10 }
  0x21   : > { %v259_v13 = vmul.f32 %v258_v11, %v251_v9 }
  0x23   : > { %v261_v15 = vmul.f32 %v260_v12, %v259_v13 }
  0x25   : > { %v263_v16 = vadd.f32 %v262_v14, %v261_v15 }
  0x27   : > { %v416_v17 = vmul.f32 -1.442695, %v263_v16 }
  0x29   : > { %458 = vpow2.f32 %v416_v17 }
  0x2f   : > { %v459_v18 = vpop.eup %458 }
  0x30   : > { %v267_v19 = vadd.f32 1.0, %v459_v18 }
  0x32   : > { %460 = vrcp.f32 %v267_v19  ;;  %v279_v22 = vand.u32 2147483648, %v267_v19  ;;  %vm273_vm1 = vweird.f32 %v267_v19  ;;  %v277_v24 = vand.u32 2147483647, %v267_v19 }
  0x34   : > { %v280_v26 = vor.u32 1.1754944e-38, %v279_v22  ;;  %vm278_vm4 = vcmp.eq.f32.partialorder %v277_v24, 8.507059e+37 }
  0x38   : > { %v461_v20 = vpop.eup %460 }
  0x39   : > { %v269_v21 = vmul.f32 %v461_v20, %v267_v19  ;;  %vm274_vm2 = vweird.f32 %v461_v20 }
  0x3a   : > { %vm275_vm3 = vmor %vm273_vm1, %vm274_vm2 }
  0x3b   : > { %v270_v23 = vsub.f32 1.0, %v269_v21 }
  0x3d   : > { %v271_v25 = vmul.f32 %v461_v20, %v270_v23 }
  0x3f   : > { %v272_v27 = vadd.f32 %v461_v20, %v271_v25 }
  0x41   : > { %v276_v28 = vsel %vm275_vm3, %v461_v20, %v272_v27 }
  0x42   : > { %v281_v30 = vsel %vm278_vm4, %v280_v26, %v276_v28 }
  0x43   : > { %v283_v31 = vmul.f32 %v281_v30, %v244_v2  ;;  %v286_v32 = vsub.f32 1.0, %v281_v30  ;;  %v284_v33 = vmul.f32 %v281_v30, %v245_v3  ;;  %v285_v34 = vmul.f32 %v281_v30, %v246_v6 }
  0x45   : > { %v287_v35 = vmul.f32 %v286_v32, %v247_v29 }
  0x47   : > { %v288_v36 = vadd.f32 %v287_v35, %v283_v31  ;;  %v289_v37 = vadd.f32 %v287_v35, %v284_v33  ;;  %v290_v38 = vadd.f32 %v287_v35, %v285_v34 }
  0x49   : > { %291 = vst [vmem:[%s243_s6] sm:$0xff] %v288_v36 }
  0x4a   : > { %292 = vst [vmem:[%s243_s6 + $0x8] sm:$0xff] %v289_v37 }
  0x4b   : > { %293 = vst [vmem:[%s243_s6 + $0x10] sm:$0xff] %v290_v38 }
  0x4c PF: > { %s14_s14 = sadd.s32 1, %s503_s14   ;;  %s579_s12 = smov %s499_s13 }
  0x4d   : > { %p11_p8 = scmp.ge.s32.totalorder %s14_s14, 4   ;;  %s580_s13 = smov %s582_s16 }
  0x4f   :  { %13 = sbr.rel (!%p11_p8) target bundleno = 2 (0x2), region = 70 }
  0x54   :  { %321 = vsyncpa [#allocation3], 1 }
  0x55   :  { %323 = vsyncpa [#allocation3 + $0x1], 1 }

// kernel: _forward_rgbt.3
= control target key start
LH: loop header
LB: loop body
LE: loop exit
PB: predicated region body
PF: predicated region fallthrough
CT: control target
= control target key end

     0   :  { %s2379_s0 = inlined_call_operand.vmem [shape: bf16[128,48], index: 0, kind: input, shape index: {}]   ;;  %s2380_s1 = inlined_call_operand.vmem [shape: bf16[48,256], index: 1, kind: input, shape index: {}]   ;;  %s2381_s2 = inlined_call_operand.vmem [shape: f32[1,256], index: 2, kind: input, shape index: {}]   ;;  %s2382_s3 = inlined_call_operand.vmem [shape: bf16[256,256], index: 3, kind: input, shape index: {}]   ;;  %s2383_s4 = inlined_call_operand.vmem [shape: f32[1,256], index: 4, kind: input, shape index: {}]   ;;  %s2384_s5 = inlined_call_operand.vmem [shape: bf16[256,128], index: 5, kind: input, shape index: {}]   ;;  %s2385_s6 = inlined_call_operand.vmem [shape: f32[1,128], index: 6, kind: input, shape index: {}]   ;;  %s2386_s7 = inlined_call_operand.hbm [shape: bf16[128,256], index: 7, kind: output, shape index: {0}]   ;;  %s2387_s8 = inlined_call_operand.vmem [shape: bf16[128,128], index: 8, kind: output, shape index: {1}]  }
   0x1   :  { %2389 = sst [smem:[#allocation5_spill]] %s2379_s0 }
   0x2   :  { %2390 = sst [smem:[#allocation6_spill]] %s2380_s1 }
   0x3   :  { %14 = vsyncpa [#allocation3], 0 }
   0x4   :  { %16 = vsyncpa [#allocation3 + $0x1], 0  ;;  %s1827_s27 = smov 0   ;;  %s1829_s28 = smov 0  }
   0x5   :  { %s1831_s29 = smov 0   ;;  %s1833_s30 = smov 0  }
   0x6 LB: > { %s1848_s9 = sadd.s32 4294967295, %s1778_s30   ;;  %s1304_s10 = sadd.s32 4294967294, %s1778_s30   ;;  %s1778_s30 = sphi %s1833_s30, %s2399_s30   ;;  %s1774_s29 = sphi %s1831_s29, %s2398_s29   ;;  %s1770_s28 = sphi %s1829_s28, %s2397_s28   ;;  %s1766_s27 = sphi %s1827_s27, %s2396_s27  }
   0x7   : > { %s1852_s11 = sadd.s32 1, %s1778_s30   ;;  %s181_s12 = sadd.s32 1, %s1774_s29 }
   0x8   : > { %s178_s13 = ssub.s32 %s1778_s30, %s1852_s11  ;;  %p191_p0 = scmp.ne.s32.totalorder %s1774_s29, %s1770_s28 }
   0x9   : > { %p179_p1 = scmp.eq.s32.totalorder %s178_s13, 0  ;;  %p192_p2 = scmp.eq.s32.totalorder %s1848_s9, 1 }
   0xa   : > { %p197_p3 = scmp.ne.s32.totalorder %s1770_s28, %s1766_s27  ;;  %p198_p4 = scmp.eq.s32.totalorder %s1304_s10, 1 }
   0xb   : > { %s1863_s14 = scalar_select %p179_p1, %s1774_s29, %s181_s12  }
   0xc   : > { %p1865_p5 = por %p192_p2, %p191_p0  ;;  %p1869_p6 = por %p198_p4, %p197_p3 }
   0xd   : > { %p1307_p7 = scmp.ge.s32.totalorder %s1778_s30, 1  ;;  %p269_p8 = scmp.lt.s32.totalorder %s1778_s30, 3 }
   0xf   : > { %p270_p9 = pnand %p1307_p7, %p269_p8 }
  0x10   : > { %s2393_s1 = sld [smem:[#allocation6_spill]] (!%p270_p9)  ;;  %s1309_s24 = sshll.u32 (!%p270_p9), %s1848_s9, 3 }
  0x11   : > { %273 = sbr.rel (%p270_p9) target bundleno = 542 (0x21e), region = 48  ;;  %p309_p10 = scmp.lt.s32.totalorder (!%p270_p9), %s1309_s24, 15 }
  0x12   : > { %s2394_s0 = sld [smem:[#allocation5_spill]] (!%p270_p9)  ;;  %s1618_s21 = sshll.u32 (!%p270_p9), %s1848_s9, 6 }
  0x13   : > { %s1209_s25 = scalar_lea.hbm (!%p270_p9), %s2386_s7, %s1618_s21  ;;  %s1736_s9 = scalar_lea.hbm (!%p270_p9), %s2386_s7, 128 }
  0x14   : > { %s1212_s10 = sshll.u32 (!%p270_p9), %s1209_s25, 4  ;;  %s1213_s10 = int_to_ptr.hbm [resolvable:$true] %s1212_s10 }
  0x15   : > { %s1730_s12 = sshra.s32 (!%p270_p9), %s1213_s10, 4  ;;  %s1731_s12 = int_to_ptr.hbm [resolvable:$true] %s1730_s12 }
  0x16   : > { %v1347_v0 = vld [vmem:[%s2393_s1 + $0x20] sm:$0xf]  ;;  %v1568_v1 = vld [vmem:[%s2393_s1 + $0x24] sm:$0xf0]  ;;  %v1567_v2 = vld [vmem:[%s2393_s1 + $0x24] sm:$0xf]  ;;  %p1737_p0 = scmp.lt.s32.totalorder %s1731_s12, %s2386_s7 }
  0x17   : > { %v1348_v3 = vor.u32 %v1568_v1, %v1347_v0  ;;  %v1349_v4 = vld [vmem:[%s2393_s1 + $0x28] sm:$0xf0]  ;;  %v1339_v5 = vld [vmem:[%s2393_s1 + $0x10] sm:$0xf]  ;;  %v1566_v6 = vld [vmem:[%s2393_s1 + $0x14] sm:$0xf0] }
  0x18   : > { %v1352_v7 = vor.u32 %v1567_v2, %v1349_v4  ;;  %v1565_v8 = vld [vmem:[%s2393_s1 + $0x14] sm:$0xf]  ;;  %v1341_v9 = vld [vmem:[%s2393_s1 + $0x18] sm:$0xf0]  ;;  %v1340_v10 = vor.u32 %v1566_v6, %v1339_v5  ;;  %v1331_v11 = vld [vmem:[%s2393_s1] sm:$0xf] }
  0x19   : > { %410 = vmatpush.bf16.msra.mxu0 %v1348_v3  ;;  %v1344_v12 = vor.u32 %v1565_v8, %v1341_v9  ;;  %v1564_v13 = vld [vmem:[%s2393_s1 + $0x4] sm:$0xf0]  ;;  %v1563_v14 = vld [vmem:[%s2393_s1 + $0x4] sm:$0xf]  ;;  %v1333_v15 = vld [vmem:[%s2393_s1 + $0x8] sm:$0xf0] }
  0x1a   : > { %439 = vmatpush.bf16.msra.mxu1 %v1352_v7  ;;  %v1332_v16 = vor.u32 %v1564_v13, %v1331_v11  ;;  %s2401_s24 = smov (!%p309_p10, %s1309_s24), 15  ;;  %v1336_v17 = vor.u32 %v1563_v14, %v1333_v15  ;;  %vm392_vm0 = vcmask 392192   ;;  %v1583_v20 = vld [vmem:[%s2382_s3 + $0x74] sm:$0xf]  ;;  %v1421_v21 = vld [vmem:[%s2382_s3 + $0x78] sm:$0xf0] }
  0x1b   : > { %s2388_s13 = sshll.u32 %s2401_s24, 2  ;;  %v1599_v22 = vld [vmem:[%s2382_s3 + $0xf4] sm:$0xf]  ;;  %v1424_v23 = vor.u32 %v1583_v20, %v1421_v21  ;;  %v1485_v24 = vld [vmem:[%s2382_s3 + $0xf8] sm:$0xf0]  ;;  %s1732_s17 = scalar_lea.hbm %s1731_s12, 64 }
  0x1c   : > { %s1920_s19 = scalar_lea.vmem %s2394_s0, %s2388_s13  ;;  %v1581_v25 = vld [vmem:[%s2382_s3 + $0x64] sm:$0xf]  ;;  %v1413_v26 = vld [vmem:[%s2382_s3 + $0x68] sm:$0xf0]  ;;  %v1488_v27 = vor.u32 %v1599_v22, %v1485_v24  ;;  %v1579_v32 = vld [vmem:[%s2382_s3 + $0x54] sm:$0xf]  ;;  %p1733_p11 = scmp.ne.s32.totalorder %s1731_s12, %s1732_s17 }
  0x1d   : > { %411 = vmatpush.bf16.msra.mxu0 %v1340_v10  ;;  %v1559_v18 = vld [vmem:[%s1920_s19] sm:$0xff]  ;;  %v1560_v19 = vld [vmem:[%s1920_s19 + $0x8] sm:$0xff]  ;;  %v1416_v30 = vor.u32 %v1581_v25, %v1413_v26  ;;  %v1405_v33 = vld [vmem:[%s2382_s3 + $0x58] sm:$0xf0]  ;;  %p1738_p1 = scmp.lt.s32.totalorder %s1736_s9, %s1732_s17 }
  0x1e   : > { %440 = vmatpush.bf16.msra.mxu1 %v1344_v12  ;;  %v1597_v28 = vld [vmem:[%s2382_s3 + $0xe4] sm:$0xf]  ;;  %v1477_v29 = vld [vmem:[%s2382_s3 + $0xe8] sm:$0xf0]  ;;  %v1595_v34 = vld [vmem:[%s2382_s3 + $0xd4] sm:$0xf]  ;;  %v1408_v36 = vor.u32 %v1579_v32, %v1405_v33  ;;  %p1734_p12 = pnand %p1733_p11, %p1865_p5 }
  0x1f   : > { %v1480_v31 = vor.u32 %v1597_v28, %v1477_v29  ;;  %v1469_v35 = vld [vmem:[%s2382_s3 + $0xd8] sm:$0xf0]  ;;  %v1561_v38 = vld [vmem:[%s1920_s19 + $0x10] sm:$0xff]  ;;  %v1584_v41 = vld [vmem:[%s2382_s3 + $0x74] sm:$0xf0]  ;;  %p1739_p2 = por %p1738_p1, %p1737_p0 }
  0x20   : > { %v1472_v37 = vor.u32 %v1595_v34, %v1469_v35  ;;  %v1562_v39 = vld [vmem:[%s1920_s19 + $0x18] sm:$0xff]  ;;  %v1419_v40 = vld [vmem:[%s2382_s3 + $0x70] sm:$0xf]  ;;  %v1411_v46 = vld [vmem:[%s2382_s3 + $0x60] sm:$0xf]  ;;  %s298_s19 = sand.u32 1, %s1770_s28   ;;  %p1735_p13 = pneg %p1734_p12 }
  0x21   : > { %412 = vmatpush.bf16.msra.mxu0 %v1332_v16  ;;  %v1483_v42 = vld [vmem:[%s2382_s3 + $0xf0] sm:$0xf]  ;;  %v1420_v43 = vor.u32 %v1584_v41, %v1419_v40  ;;  %v1600_v44 = vld [vmem:[%s2382_s3 + $0xf4] sm:$0xf0]  ;;  %v1582_v47 = vld [vmem:[%s2382_s3 + $0x64] sm:$0xf0] }
  0x22   : > { %441 = vmatpush.bf16.msra.mxu1 %v1336_v17  ;;  %v1484_v45 = vor.u32 %v1600_v44, %v1483_v42  ;;  %v1475_v48 = vld [vmem:[%s2382_s3 + $0xe0] sm:$0xf]  ;;  %v1412_v49 = vor.u32 %v1582_v47, %v1411_v46  ;;  %v1598_v50 = vld [vmem:[%s2382_s3 + $0xe4] sm:$0xf0]  ;;  %v1577_v52 = vld [vmem:[%s2382_s3 + $0x44] sm:$0xf]  ;;  %p1740_p3 = pnand %p1739_p2, %p1735_p13 }
  0x23   : > { %813 = vmatpush.bf16.msra.mxu2 %v1420_v43  ;;  %v1476_v51 = vor.u32 %v1598_v50, %v1475_v48  ;;  %v1397_v53 = vld [vmem:[%s2382_s3 + $0x48] sm:$0xf0]  ;;  %v1593_v54 = vld [vmem:[%s2382_s3 + $0xc4] sm:$0xf]  ;;  %v1403_v57 = vld [vmem:[%s2382_s3 + $0x50] sm:$0xf] }
  0x24   : > { %1353 = vmatmul.msk.bf16.vlgmr.msra.gmra.mxu0 %vm392_vm0, %v1559_v18  ;;  %842 = vmatpush.bf16.msra.mxu3 %v1484_v45  ;;  %v1400_v55 = vor.u32 %v1577_v52, %v1397_v53  ;;  %v1461_v56 = vld [vmem:[%s2382_s3 + $0xc8] sm:$0xf0]  ;;  %v1580_v58 = vld [vmem:[%s2382_s3 + $0x54] sm:$0xf0]  ;;  %v1467_v61 = vld [vmem:[%s2382_s3 + $0xd0] sm:$0xf] }
  0x25   : > { %1357 = vmatmul.msk.bf16.vlgmr.msra.gmra.mxu1 %vm392_vm0, %v1559_v18  ;;  %871 = vmatpush.bf16.msrb.mxu0 %v1424_v23  ;;  %v1464_v59 = vor.u32 %v1593_v54, %v1461_v56  ;;  %v1404_v60 = vor.u32 %v1580_v58, %v1403_v57  ;;  %v1596_v62 = vld [vmem:[%s2382_s3 + $0xd4] sm:$0xf0]  ;;  %v1395_v0 = vld [vmem:[%s2382_s3 + $0x40] sm:$0xf]  ;;  %v1578_v1 = vld [vmem:[%s2382_s3 + $0x44] sm:$0xf0] }
  0x26   : > { %900 = vmatpush.bf16.msrb.mxu1 %v1488_v27  ;;  %v1468_v63 = vor.u32 %v1596_v62, %v1467_v61  ;;  %v1459_v2 = vld [vmem:[%s2382_s3 + $0xc0] sm:$0xf]  ;;  %v1396_v3 = vor.u32 %v1578_v1, %v1395_v0  ;;  %v1594_v4 = vld [vmem:[%s2382_s3 + $0xc4] sm:$0xf0]  ;;  %v1575_v6 = vld [vmem:[%s2382_s3 + $0x34] sm:$0xf] }
  0x27   : > { %814 = vmatpush.bf16.msra.mxu2 %v1412_v49  ;;  %v1460_v5 = vor.u32 %v1594_v4, %v1459_v2  ;;  %v1389_v7 = vld [vmem:[%s2382_s3 + $0x38] sm:$0xf0]  ;;  %v1591_v8 = vld [vmem:[%s2382_s3 + $0xb4] sm:$0xf]  ;;  %v1387_v11 = vld [vmem:[%s2382_s3 + $0x30] sm:$0xf] }
  0x28   : > { %843 = vmatpush.bf16.msra.mxu3 %v1476_v51  ;;  %v1392_v9 = vor.u32 %v1575_v6, %v1389_v7  ;;  %v1453_v10 = vld [vmem:[%s2382_s3 + $0xb8] sm:$0xf0]  ;;  %v1576_v12 = vld [vmem:[%s2382_s3 + $0x34] sm:$0xf0]  ;;  %v1451_v15 = vld [vmem:[%s2382_s3 + $0xb0] sm:$0xf] }
  0x29   : > { %872 = vmatpush.bf16.msrb.mxu0 %v1416_v30  ;;  %v1456_v13 = vor.u32 %v1591_v8, %v1453_v10  ;;  %v1388_v14 = vor.u32 %v1576_v12, %v1387_v11  ;;  %v1592_v16 = vld [vmem:[%s2382_s3 + $0xb4] sm:$0xf0]  ;;  %v1573_v18 = vld [vmem:[%s2382_s3 + $0x24] sm:$0xf]  ;;  %v1445_v22 = vld [vmem:[%s2382_s3 + $0xa8] sm:$0xf0] }
  0x2a   : > { %901 = vmatpush.bf16.msrb.mxu1 %v1480_v31  ;;  %v1452_v17 = vor.u32 %v1592_v16, %v1451_v15  ;;  %v1589_v20 = vld [vmem:[%s2382_s3 + $0xa4] sm:$0xf]  ;;  %v1379_v23 = vld [vmem:[%s2382_s3 + $0x20] sm:$0xf]  ;;  %v1574_v24 = vld [vmem:[%s2382_s3 + $0x24] sm:$0xf0] }
  0x2b   : > { %815 = vmatpush.bf16.msra.mxu2 %v1404_v60  ;;  %v1448_v25 = vor.u32 %v1589_v20, %v1445_v22  ;;  %v1380_v26 = vor.u32 %v1574_v24, %v1379_v23  ;;  %v1443_v27 = vld [vmem:[%s2382_s3 + $0xa0] sm:$0xf]  ;;  %v1590_v28 = vld [vmem:[%s2382_s3 + $0xa4] sm:$0xf0]  ;;  %v1571_v31 = vld [vmem:[%s2382_s3 + $0x14] sm:$0xf] }
  0x2c   : > { %844 = vmatpush.bf16.msra.mxu3 %v1468_v63  ;;  %v336_v29 = vld [vmem:[%s2381_s2] sm:$0x3]  ;;  %v1444_v30 = vor.u32 %v1590_v28, %v1443_v27  ;;  %v1373_v32 = vld [vmem:[%s2382_s3 + $0x18] sm:$0xf0]  ;;  %v1587_v33 = vld [vmem:[%s2382_s3 + $0x94] sm:$0xf] }
  0x2d   : > { %873 = vmatpush.bf16.msrb.mxu0 %v1408_v36  ;;  %v1376_v34 = vor.u32 %v1571_v31, %v1373_v32  ;;  %v1437_v35 = vld [vmem:[%s2382_s3 + $0x98] sm:$0xf0]  ;;  %v1371_v36 = vld [vmem:[%s2382_s3 + $0x10] sm:$0xf]  ;;  %v1588_v42 = vld [vmem:[%s2382_s3 + $0x94] sm:$0xf0] }
  0x2e   : > { %902 = vmatpush.bf16.msrb.mxu1 %v1472_v37  ;;  %v1572_v37 = vld [vmem:[%s2382_s3 + $0x14] sm:$0xf0]  ;;  %v1435_v41 = vld [vmem:[%s2382_s3 + $0x90] sm:$0xf]  ;;  %v2107_v43 = vperm.slane %v336_v29, 1  ;;  %s1308_s18 = sshll.u32 %s298_s19, 6 }
  0x2f   : > { %816 = vmatpush.bf16.msra.mxu2 %v1396_v3  ;;  %v1372_v40 = vor.u32 %v1572_v37, %v1371_v36  ;;  %v1436_v44 = vor.u32 %v1588_v42, %v1435_v41  ;;  %v1363_v45 = vld [vmem:[%s2382_s3] sm:$0xf]  ;;  %v1570_v46 = vld [vmem:[%s2382_s3 + $0x4] sm:$0xf0]  ;;  %v1569_v51 = vld [vmem:[%s2382_s3 + $0x4] sm:$0xf] }
  0x30   : > { %845 = vmatpush.bf16.msra.mxu3 %v1460_v5  ;;  %v1427_v47 = vld [vmem:[%s2382_s3 + $0x80] sm:$0xf]  ;;  %v1364_v49 = vor.u32 %v1570_v46, %v1363_v45  ;;  %v1586_v50 = vld [vmem:[%s2382_s3 + $0x84] sm:$0xf0]  ;;  %v1365_v52 = vld [vmem:[%s2382_s3 + $0x8] sm:$0xf0] }
  0x31   : > { %874 = vmatpush.bf16.msrb.mxu0 %v1400_v55  ;;  %v1428_v55 = vor.u32 %v1586_v50, %v1427_v47  ;;  %v1368_v56 = vor.u32 %v1569_v51, %v1365_v52  ;;  %v1585_v57 = vld [vmem:[%s2382_s3 + $0x84] sm:$0xf]  ;;  %v1429_v58 = vld [vmem:[%s2382_s3 + $0x88] sm:$0xf0]  ;;  %s2307_s20 = scalar_lea.vmem [#allocation2], %s1308_s18  ;;  %s1192_s13 = scalar_lea.sflag [#allocation3], %s298_s19 }
  0x32   : > { %903 = vmatpush.bf16.msrb.mxu1 %v1464_v59  ;;  %v1432_v60 = vor.u32 %v1585_v57, %v1429_v58  ;;  %s1210_s26 = sshll.u32 %s2307_s20, 4  ;;  %s1211_s26 = int_to_ptr.vmem [resolvable:$true] %s1210_s26 }
  0x33   : > { %817 = vmatpush.bf16.msra.mxu2 %v1388_v14 }
  0x34   : > { %1354 = vmatmul.msk.bf16.gmra.mxu0 %vm392_vm0, %v1560_v19  ;;  %846 = vmatpush.bf16.msra.mxu3 %v1452_v17 }
  0x35   : > { %1358 = vmatmul.msk.bf16.gmra.mxu1 %vm392_vm0, %v1560_v19  ;;  %875 = vmatpush.bf16.msrb.mxu0 %v1392_v9  ;;  %v1381_v19 = vld [vmem:[%s2382_s3 + $0x28] sm:$0xf0] }
  0x36   : > { %904 = vmatpush.bf16.msrb.mxu1 %v1456_v13  ;;  %v1384_v21 = vor.u32 %v1573_v18, %v1381_v19 }
  0x37   : > { %818 = vmatpush.bf16.msra.mxu2 %v1380_v26 }
  0x38   : > { %847 = vmatpush.bf16.msra.mxu3 %v1444_v30 }
  0x39   : > { %876 = vmatpush.bf16.msrb.mxu0 %v1384_v21 }
  0x3a   : > { %905 = vmatpush.bf16.msrb.mxu1 %v1448_v25 }
  0x3b   : > { %819 = vmatpush.bf16.msra.mxu2 %v1372_v40 }
  0x3c   : > { %848 = vmatpush.bf16.msra.mxu3 %v1436_v44 }
  0x3d   : > { %877 = vmatpush.bf16.msrb.mxu0 %v1376_v34 }
  0x3f   : > { %820 = vmatpush.bf16.msra.mxu2 %v1364_v49 }
  0x40   : > { %849 = vmatpush.bf16.msra.mxu3 %v1428_v55 }
  0x41   : > { %878 = vmatpush.bf16.msrb.mxu0 %v1368_v56 }
  0x44   : > { %1355 = vmatmul.msk.bf16.gmra.mxu0 %vm392_vm0, %v1561_v38 }
  0x45   : > { %1359 = vmatmul.msk.bf16.gmra.mxu1 %vm392_vm0, %v1561_v38  ;;  %v2099_v38 = vperm.slane %v336_v29, 0 }
  0x54   : > { %1356 = vmatmul.msk.bf16.gmra.mxu0 %vm392_vm0, %v1562_v39 }
  0x55   : > { %1360 = vmatmul.msk.bf16.gmra.mxu1 %vm392_vm0, %v1562_v39  ;;  %v1440_v39 = vor.u32 %v1587_v33, %v1437_v35 }
  0x57   : > { %906 = vmatpush.bf16.msrb.mxu1 %v1440_v39 }
  0x5b   : > { %907 = vmatpush.bf16.msrb.mxu1 %v1432_v60 }
  0xa1   : > { %v414_v48 = vpop.f32.mrf.mxu0 }
  0xa2   : > { %v2128_v53 = vadd.f32 %v414_v48, %v2099_v38  ;;  %v443_v54 = vpop.f32.mrf.mxu1 }
  0xa3   : > { %v2137_v59 = vadd.f32 %v443_v54, %v2107_v43 }
  0xa4   : > { %v463_v61 = vmul.f32 %v2128_v53, %v2128_v53 }
  0xa5   : > { %v464_v62 = vmul.f32 %v2137_v59, %v2137_v59 }
  0xa6   : > { %v479_v63 = vmul.f32 %v463_v61, %v2128_v53 }
  0xa7   : > { %v480_v0 = vmul.f32 %v464_v62, %v2137_v59 }
  0xa8   : > { %v495_v1 = vmul.f32 0.044715, %v479_v63 }
  0xa9   : > { %v496_v2 = vmul.f32 0.044715, %v480_v0  ;;  %v416_v3 = vpop.f32.mrf.mxu0 }
  0xaa   : > { %v511_v4 = vadd.f32 %v495_v1, %v2128_v53  ;;  %v417_v5 = vadd.f32 %v416_v3, %v2099_v38  ;;  %v445_v6 = vpop.f32.mrf.mxu1 }
  0xab   : > { %v512_v7 = vadd.f32 %v496_v2, %v2137_v59  ;;  %v446_v8 = vadd.f32 %v445_v6, %v2107_v43 }
  0xac   : > { %v465_v9 = vmul.f32 %v417_v5, %v417_v5  ;;  %v527_v10 = vmul.f32 0.7978846, %v511_v4 }
  0xad   : > { %v466_v11 = vmul.f32 %v446_v8, %v446_v8  ;;  %v528_v12 = vmul.f32 0.7978846, %v512_v7 }
  0xae   : > { %v481_v13 = vmul.f32 %v465_v9, %v417_v5  ;;  %1684 = vtanh.f32 %v527_v10 }
  0xaf   : > { %v482_v14 = vmul.f32 %v466_v11, %v446_v8  ;;  %1686 = vtanh.f32 %v528_v12 }
  0xb0   : > { %v497_v15 = vmul.f32 0.044715, %v481_v13 }
  0xb1   : > { %v498_v16 = vmul.f32 0.044715, %v482_v14  ;;  %v419_v17 = vpop.f32.mrf.mxu0 }
  0xb2   : > { %v513_v18 = vadd.f32 %v497_v15, %v417_v5  ;;  %v2150_v19 = vadd.f32 %v419_v17, %v2099_v38  ;;  %v448_v20 = vpop.f32.mrf.mxu1 }
  0xb3   : > { %v514_v21 = vadd.f32 %v498_v16, %v446_v8  ;;  %v2153_v22 = vadd.f32 %v448_v20, %v2107_v43 }
  0xb4   : > { %v467_v23 = vmul.f32 %v2150_v19, %v2150_v19  ;;  %v529_v24 = vmul.f32 0.7978846, %v513_v18  ;;  %v1685_v27 = vpop.eup %1684 }
  0xb5   : > { %v468_v25 = vmul.f32 %v2153_v22, %v2153_v22  ;;  %v530_v26 = vmul.f32 0.7978846, %v514_v21  ;;  %v1687_v29 = vpop.eup %1686  ;;  %v559_v34 = vadd.f32 1.0, %v1685_v27 }
  0xb6   : > { %v483_v28 = vmul.f32 %v467_v23, %v2150_v19  ;;  %1688 = vtanh.f32 %v529_v24  ;;  %v560_v39 = vadd.f32 1.0, %v1687_v29 }
  0xb7   : > { %v484_v30 = vmul.f32 %v468_v25, %v2153_v22  ;;  %1690 = vtanh.f32 %v530_v26  ;;  %v575_v49 = vmul.f32 0.5, %v559_v34 }
  0xb8   : > { %v499_v31 = vmul.f32 0.044715, %v483_v28  ;;  %v576_v54 = vmul.f32 0.5, %v560_v39 }
  0xb9   : > { %v500_v32 = vmul.f32 0.044715, %v484_v30  ;;  %v421_v33 = vpop.f32.mrf.mxu0  ;;  %v591_v62 = vmul.f32 %v575_v49, %v2128_v53 }
  0xba   : > { %v515_v35 = vadd.f32 %v499_v31, %v2150_v19  ;;  %v2163_v36 = vadd.f32 %v421_v33, %v2099_v38  ;;  %v450_v37 = vpop.f32.mrf.mxu1  ;;  %v592_v3 = vmul.f32 %v576_v54, %v2137_v59 }
  0xbb   : > { %v516_v40 = vadd.f32 %v500_v32, %v2153_v22  ;;  %v2167_v41 = vadd.f32 %v450_v37, %v2107_v43 }
  0xbc   : > { %v1689_v42 = vpop.eup %1688  ;;  %v469_v44 = vmul.f32 %v2163_v36, %v2163_v36  ;;  %v531_v45 = vmul.f32 0.7978846, %v515_v35 }
  0xbd   : > { %v1691_v46 = vpop.eup %1690  ;;  %v470_v47 = vmul.f32 %v2167_v41, %v2167_v41  ;;  %v561_v48 = vadd.f32 1.0, %v1689_v42  ;;  %v532_v50 = vmul.f32 0.7978846, %v516_v40 }
  0xbe   : > { %v485_v51 = vmul.f32 %v469_v44, %v2163_v36  ;;  %v562_v52 = vadd.f32 1.0, %v1691_v46  ;;  %1692 = vtanh.f32 %v531_v45 }
  0xbf   : > { %v486_v55 = vmul.f32 %v470_v47, %v2167_v41  ;;  %v577_v56 = vmul.f32 0.5, %v561_v48  ;;  %1694 = vtanh.f32 %v532_v50 }
  0xc0   : > { %v501_v57 = vmul.f32 0.044715, %v485_v51  ;;  %v578_v58 = vmul.f32 0.5, %v562_v52 }
  0xc1   : > { %v502_v60 = vmul.f32 0.044715, %v486_v55  ;;  %v424_v61 = vpop.f32.mrf.mxu0  ;;  %v593_v63 = vmul.f32 %v577_v56, %v417_v5 }
  0xc2   : > { %v517_v0 = vadd.f32 %v501_v57, %v2163_v36  ;;  %v2178_v1 = vadd.f32 %v424_v61, %v2099_v38  ;;  %v453_v2 = vpop.f32.mrf.mxu1  ;;  %v594_v4 = vmul.f32 %v578_v58, %v446_v8 }
  0xc3   : > { %v518_v6 = vadd.f32 %v502_v60, %v2167_v41  ;;  %v2183_v7 = vadd.f32 %v453_v2, %v2107_v43  ;;  %v607_v9 = vpack.c.bf16 %v593_v63, %v591_v62  ;;  %v1608_v63 = vld [vmem:[%s2384_s5 + $0x38] sm:$0xff] }
  0xc4   : > { %v471_v53 = vmul.f32 %v2178_v1, %v2178_v1  ;;  %v608_v5 = vpack.c.bf16 %v594_v4, %v592_v3  ;;  %v533_v10 = vmul.f32 0.7978846, %v517_v0  ;;  %v1693_v13 = vpop.eup %1692  ;;  %v1616_v0 = vld [vmem:[%s2384_s5 + $0x78] sm:$0xff]  ;;  %1117 = vmatpush.bf16.msrb.mxu2 %v1608_v63 }
  0xc5   : > { %v472_v11 = vmul.f32 %v2183_v7, %v2183_v7  ;;  %821 = vmatmul.bf16.vlgmr.msra.gmra.mxu2 %v607_v9  ;;  %879 = vmatmul.bf16.vlgmr.msrb.gmra.mxu0 %v607_v9  ;;  %v534_v12 = vmul.f32 0.7978846, %v518_v6  ;;  %v1695_v8 = vpop.eup %1694  ;;  %v563_v18 = vadd.f32 1.0, %v1693_v13  ;;  %v1607_v6 = vld [vmem:[%s2384_s5 + $0x30] sm:$0xff] }
  0xc6   : > { %v487_v59 = vmul.f32 %v471_v53, %v2178_v1  ;;  %850 = vmatmul.bf16.vlgmr.msra.gmra.mxu3 %v608_v5  ;;  %908 = vmatmul.bf16.vlgmr.msrb.gmra.mxu1 %v608_v5  ;;  %1696 = vtanh.f32 %v533_v10  ;;  %v564_v24 = vadd.f32 1.0, %v1695_v8  ;;  %v1615_v9 = vld [vmem:[%s2384_s5 + $0x70] sm:$0xff] }
  0xc7   : > { %v488_v14 = vmul.f32 %v472_v11, %v2183_v7  ;;  %1698 = vtanh.f32 %v534_v12  ;;  %v579_v33 = vmul.f32 0.5, %v563_v18  ;;  %1146 = vmatpush.bf16.msrb.mxu3 %v1616_v0  ;;  %v1606_v18 = vld [vmem:[%s2384_s5 + $0x28] sm:$0xff] }
  0xc8   : > { %v503_v15 = vmul.f32 0.044715, %v487_v59  ;;  %v580_v39 = vmul.f32 0.5, %v564_v24  ;;  %1118 = vmatpush.bf16.msrb.mxu2 %v1607_v6  ;;  %v1610_v6 = vld [vmem:[%s2384_s5 + $0x48] sm:$0xff] }
  0xc9   : > { %v504_v16 = vmul.f32 0.044715, %v488_v14  ;;  %v426_v17 = vpop.f32.mrf.mxu0  ;;  %v595_v48 = vmul.f32 %v579_v33, %v2150_v19 }
  0xca   : > { %v519_v20 = vadd.f32 %v503_v15, %v2178_v1  ;;  %v2193_v21 = vadd.f32 %v426_v17, %v2099_v38  ;;  %v455_v23 = vpop.f32.mrf.mxu1  ;;  %v596_v54 = vmul.f32 %v580_v39, %v2153_v22 }
  0xcb   : > { %v520_v25 = vadd.f32 %v504_v16, %v2183_v7  ;;  %v2197_v26 = vadd.f32 %v455_v23, %v2107_v43  ;;  %1147 = vmatpush.bf16.msrb.mxu3 %v1615_v9  ;;  %v1601_v9 = vld [vmem:[%s2384_s5] sm:$0xff] }
  0xcc   : > { %v1697_v27 = vpop.eup %1696  ;;  %v473_v28 = vmul.f32 %v2193_v21, %v2193_v21  ;;  %v535_v29 = vmul.f32 0.7978846, %v519_v20  ;;  %1119 = vmatpush.bf16.msrb.mxu2 %v1606_v18 }
  0xcd   : > { %v1699_v30 = vpop.eup %1698  ;;  %v474_v31 = vmul.f32 %v2197_v26, %v2197_v26  ;;  %v565_v32 = vadd.f32 1.0, %v1697_v27  ;;  %v536_v34 = vmul.f32 0.7978846, %v520_v25 }
  0xce   : > { %v489_v35 = vmul.f32 %v473_v28, %v2193_v21  ;;  %v566_v37 = vadd.f32 1.0, %v1699_v30  ;;  %1700 = vtanh.f32 %v535_v29 }
  0xcf   : > { %v490_v40 = vmul.f32 %v474_v31, %v2197_v26  ;;  %v581_v42 = vmul.f32 0.5, %v565_v32  ;;  %1702 = vtanh.f32 %v536_v34  ;;  %v1605_v34 = vld [vmem:[%s2384_s5 + $0x20] sm:$0xff] }
  0xd0   : > { %v505_v44 = vmul.f32 0.044715, %v489_v35  ;;  %v582_v45 = vmul.f32 0.5, %v566_v37  ;;  %v1613_v35 = vld [vmem:[%s2384_s5 + $0x60] sm:$0xff]  ;;  %1120 = vmatpush.bf16.msrb.mxu2 %v1605_v34 }
  0xd1   : > { %v506_v46 = vmul.f32 0.044715, %v490_v40  ;;  %v429_v47 = vpop.f32.mrf.mxu0  ;;  %v597_v49 = vmul.f32 %v581_v42, %v2163_v36 }
  0xd2   : > { %v521_v50 = vadd.f32 %v505_v44, %v2193_v21  ;;  %v2209_v51 = vadd.f32 %v429_v47, %v2099_v38  ;;  %v458_v52 = vpop.f32.mrf.mxu1  ;;  %v598_v55 = vmul.f32 %v582_v45, %v2167_v41 }
  0xd3   : > { %v522_v56 = vadd.f32 %v506_v46, %v2197_v26  ;;  %v2215_v57 = vadd.f32 %v458_v52, %v2107_v43  ;;  %v609_v58 = vpack.c.bf16 %v597_v49, %v595_v48 }
  0xd4   : > { %v475_v19 = vmul.f32 %v2209_v51, %v2209_v51  ;;  %v610_v36 = vpack.c.bf16 %v598_v55, %v596_v54  ;;  %v537_v60 = vmul.f32 0.7978846, %v521_v50  ;;  %v1701_v22 = vpop.eup %1700 }
  0xd5   : > { %v476_v61 = vmul.f32 %v2215_v57, %v2215_v57  ;;  %826 = vmatmul.bf16.gmra.mxu2 %v609_v58  ;;  %884 = vmatmul.bf16.gmra.mxu0 %v609_v58  ;;  %v538_v62 = vmul.f32 0.7978846, %v522_v56  ;;  %v1703_v2 = vpop.eup %1702  ;;  %v567_v10 = vadd.f32 1.0, %v1701_v22 }
  0xd6   : > { %v491_v41 = vmul.f32 %v475_v19, %v2209_v51  ;;  %855 = vmatmul.bf16.gmra.mxu3 %v610_v36  ;;  %913 = vmatmul.bf16.gmra.mxu1 %v610_v36  ;;  %1704 = vtanh.f32 %v537_v60  ;;  %v568_v59 = vadd.f32 1.0, %v1703_v2 }
  0xd7   : > { %v492_v3 = vmul.f32 %v476_v61, %v2215_v57  ;;  %1706 = vtanh.f32 %v538_v62  ;;  %v583_v24 = vmul.f32 0.5, %v567_v10 }
  0xd8   : > { %v507_v4 = vmul.f32 0.044715, %v491_v41  ;;  %v584_v29 = vmul.f32 0.5, %v568_v59 }
  0xd9   : > { %v508_v53 = vmul.f32 0.044715, %v492_v3  ;;  %v431_v5 = vpop.f32.mrf.mxu0  ;;  %v599_v39 = vmul.f32 %v583_v24, %v2178_v1  ;;  %v1604_v1 = vld [vmem:[%s2384_s5 + $0x18] sm:$0xff] }
  0xda   : > { %v523_v11 = vadd.f32 %v507_v4, %v2209_v51  ;;  %v2237_v12 = vadd.f32 %v431_v5, %v2099_v38  ;;  %v460_v13 = vpop.f32.mrf.mxu1  ;;  %v1614_v38 = vld [vmem:[%s2384_s5 + $0x68] sm:$0xff]  ;;  %v600_v44 = vmul.f32 %v584_v29, %v2183_v7  ;;  %1121 = vmatpush.bf16.msrb.mxu2 %v1604_v1  ;;  %v1603_v4 = vld [vmem:[%s2384_s5 + $0x10] sm:$0xff]  ;;  %v647_v5 = vld [vmem:[%s2383_s4] sm:$0x3] }
  0xdb   : > { %v524_v8 = vadd.f32 %v508_v53, %v2215_v57  ;;  %v2241_v14 = vadd.f32 %v460_v13, %v2107_v43  ;;  %1148 = vmatpush.bf16.msrb.mxu3 %v1614_v38  ;;  %v1609_v53 = vld [vmem:[%s2384_s5 + $0x40] sm:$0xff]  ;;  %v2300_v13 = vperm.slane %v647_v5, 0 }
  0xdc   : > { %v1705_v15 = vpop.eup %1704  ;;  %v477_v16 = vmul.f32 %v2237_v12, %v2237_v12  ;;  %v539_v17 = vmul.f32 0.7978846, %v523_v11  ;;  %v2298_v11 = vperm.slane %v647_v5, 1 }
  0xdd   : > { %v1707_v20 = vpop.eup %1706  ;;  %v478_v43 = vmul.f32 %v2241_v14, %v2241_v14  ;;  %v569_v23 = vadd.f32 1.0, %v1705_v15  ;;  %v540_v25 = vmul.f32 0.7978846, %v524_v8 }
  0xde   : > { %v493_v27 = vmul.f32 %v477_v16, %v2237_v12  ;;  %v570_v28 = vadd.f32 1.0, %v1707_v20  ;;  %1708 = vtanh.f32 %v539_v17  ;;  %1122 = vmatpush.bf16.msrb.mxu2 %v1603_v4 }
  0xdf   : > { %v494_v30 = vmul.f32 %v478_v43, %v2241_v14  ;;  %v585_v31 = vmul.f32 0.5, %v569_v23  ;;  %1710 = vtanh.f32 %v540_v25  ;;  %1149 = vmatpush.bf16.msrb.mxu3 %v1613_v35 }
  0xe0   : > { %v509_v32 = vmul.f32 0.044715, %v493_v27  ;;  %v586_v33 = vmul.f32 0.5, %v570_v28 }
  0xe1   : > { %v510_v37 = vmul.f32 0.044715, %v494_v30  ;;  %v601_v40 = vmul.f32 %v585_v31, %v2193_v21  ;;  %v1612_v21 = vld [vmem:[%s2384_s5 + $0x58] sm:$0xff] }
  0xe2   : > { %v525_v42 = vadd.f32 %v509_v32, %v2237_v12  ;;  %v602_v45 = vmul.f32 %v586_v33, %v2197_v26 }
  0xe3   : > { %v526_v46 = vadd.f32 %v510_v37, %v2241_v14  ;;  %v611_v47 = vpack.c.bf16 %v601_v40, %v599_v39  ;;  %1150 = vmatpush.bf16.msrb.mxu3 %v1612_v21 }
  0xe4   : > { %v612_v48 = vpack.c.bf16 %v602_v45, %v600_v44  ;;  %v541_v49 = vmul.f32 0.7978846, %v525_v42  ;;  %v1709_v50 = vpop.eup %1708 }
  0xe5   : > { %831 = vmatmul.bf16.gmra.mxu2 %v611_v47  ;;  %889 = vmatmul.bf16.gmra.mxu0 %v611_v47  ;;  %v542_v7 = vmul.f32 0.7978846, %v526_v46  ;;  %v1711_v26 = vpop.eup %1710  ;;  %v571_v52 = vadd.f32 1.0, %v1709_v50 }
  0xe6   : > { %860 = vmatmul.bf16.gmra.mxu3 %v612_v48  ;;  %918 = vmatmul.bf16.gmra.mxu1 %v612_v48  ;;  %1712 = vtanh.f32 %v541_v49  ;;  %v572_v54 = vadd.f32 1.0, %v1711_v26 }
  0xe7   : > { %1714 = vtanh.f32 %v542_v7  ;;  %v587_v19 = vmul.f32 0.5, %v571_v52 }
  0xe8   : > { %v588_v60 = vmul.f32 0.5, %v572_v54 }
  0xe9   : > { %v603_v22 = vmul.f32 %v587_v19, %v2209_v51  ;;  %v1611_v51 = vld [vmem:[%s2384_s5 + $0x50] sm:$0xff] }
  0xea   : > { %v604_v63 = vmul.f32 %v588_v60, %v2215_v57  ;;  %1151 = vmatpush.bf16.msrb.mxu3 %v1611_v51  ;;  %v1602_v57 = vld [vmem:[%s2384_s5 + $0x8] sm:$0xff] }
  0xeb   : > { %1123 = vmatpush.bf16.msrb.mxu2 %v1602_v57 }
  0xec   : > { %v1713_v55 = vpop.eup %1712 }
  0xed   : > { %v1715_v56 = vpop.eup %1714  ;;  %v573_v58 = vadd.f32 1.0, %v1713_v55 }
  0xee   : > { %v574_v36 = vadd.f32 1.0, %v1715_v56  ;;  %1152 = vmatpush.bf16.msrb.mxu3 %v1610_v6 }
  0xef   : > { %v589_v61 = vmul.f32 0.5, %v573_v58  ;;  %1124 = vmatpush.bf16.msrb.mxu2 %v1601_v9 }
  0xf0   : > { %v590_v62 = vmul.f32 0.5, %v574_v36 }
  0xf1   : > { %v605_v41 = vmul.f32 %v589_v61, %v2237_v12 }
  0xf2   : > { %v606_v0 = vmul.f32 %v590_v62, %v2241_v14  ;;  %1153 = vmatpush.bf16.msrb.mxu3 %v1609_v53 }
  0xf3   : > { %v613_v2 = vpack.c.bf16 %v605_v41, %v603_v22 }
  0xf4   : > { %v614_v3 = vpack.c.bf16 %v606_v0, %v604_v63 }
  0xf5   : > { %836 = vmatmul.bf16.gmra.mxu2 %v613_v2  ;;  %894 = vmatmul.bf16.gmra.mxu0 %v613_v2 }
  0xf6   : > { %865 = vmatmul.bf16.gmra.mxu3 %v614_v3  ;;  %923 = vmatmul.bf16.gmra.mxu1 %v614_v3 }
 0x142   : > { %v880_v10 = vpop.f32.mrf.mxu0 }
 0x143   : > { %v909_v12 = vpop.f32.mrf.mxu1  ;;  %v881_v59 = vadd.f32 %v880_v10, %v2298_v11 }
 0x145   : > { %v910_v17 = vadd.f32 %v909_v12, %v881_v59 }
 0x148   : > { %v822_v8 = vpop.f32.mrf.mxu2 }
 0x149   : > { %v823_v14 = vadd.f32 %v822_v8, %v2300_v13  ;;  %v851_v15 = vpop.f32.mrf.mxu3 }
 0x14a   : > { %v882_v16 = vpop.f32.mrf.mxu0 }
 0x14b   : > { %v852_v18 = vadd.f32 %v851_v15, %v823_v14  ;;  %v911_v38 = vpop.f32.mrf.mxu1  ;;  %v883_v43 = vadd.f32 %v882_v16, %v2298_v11 }
 0x14d   : > { %v929_v20 = vpack.c.bf16 %v910_v17, %v852_v18  ;;  %v912_v28 = vadd.f32 %v911_v38, %v883_v43 }
 0x14f   : > { %937 = vst [vmem:[%s2307_s20] sm:$0xff] %v929_v20  ;;  %v989_v32 = vunpack.c.l.b16 %v929_v20  ;;  %v990_v35 = vunpack.c.h.b16 %v929_v20 }
 0x150   : > { %v824_v23 = vpop.f32.mrf.mxu2 }
 0x151   : > { %v825_v24 = vadd.f32 %v824_v23, %v2300_v13  ;;  %v853_v25 = vpop.f32.mrf.mxu3 }
 0x152   : > { %v885_v27 = vpop.f32.mrf.mxu0 }
 0x153   : > { %v854_v29 = vadd.f32 %v853_v25, %v825_v24  ;;  %v914_v30 = vpop.f32.mrf.mxu1  ;;  %v886_v33 = vadd.f32 %v885_v27, %v2298_v11 }
 0x155   : > { %v930_v31 = vpack.c.bf16 %v912_v28, %v854_v29  ;;  %v915_v47 = vadd.f32 %v914_v30, %v886_v33 }
 0x157   : > { %938 = vst [vmem:[%s2307_s20 + $0x8] sm:$0xff] %v930_v31  ;;  %v991_v34 = vunpack.c.l.b16 %v930_v31  ;;  %v992_v37 = vunpack.c.h.b16 %v930_v31 }
 0x158   : > { %v827_v39 = vpop.f32.mrf.mxu2 }
 0x159   : > { %v828_v40 = vadd.f32 %v827_v39, %v2300_v13  ;;  %v856_v42 = vpop.f32.mrf.mxu3  ;;  %v1005_v44 = vpack.c.b16 %v991_v34, %v989_v32  ;;  %v1006_v45 = vpack.c.b16 %v992_v37, %v990_v35 }
 0x15a   : > { %v887_v46 = vpop.f32.mrf.mxu0 }
 0x15b   : > { %v857_v48 = vadd.f32 %v856_v42, %v828_v40  ;;  %v916_v49 = vpop.f32.mrf.mxu1  ;;  %1125 = vmatmul.bf16.vlgmr.msrb.gmra.mxu2 %v1005_v44  ;;  %1154 = vmatmul.bf16.vlgmr.msrb.gmra.mxu3 %v1006_v45  ;;  %v888_v21 = vadd.f32 %v887_v46, %v2298_v11 }
 0x15d   : > { %v931_v1 = vpack.c.bf16 %v915_v47, %v857_v48  ;;  %v917_v54 = vadd.f32 %v916_v49, %v888_v21 }
 0x15f   : > { %939 = vst [vmem:[%s2307_s20 + $0x10] sm:$0xff] %v931_v1  ;;  %v993_v19 = vunpack.c.l.b16 %v931_v1  ;;  %v994_v61 = vunpack.c.h.b16 %v931_v1 }
 0x160   : > { %v829_v7 = vpop.f32.mrf.mxu2 }
 0x161   : > { %v830_v50 = vadd.f32 %v829_v7, %v2300_v13  ;;  %v858_v26 = vpop.f32.mrf.mxu3 }
 0x162   : > { %v890_v52 = vpop.f32.mrf.mxu0 }
 0x163   : > { %v859_v55 = vadd.f32 %v858_v26, %v830_v50  ;;  %v919_v56 = vpop.f32.mrf.mxu1  ;;  %v891_v36 = vadd.f32 %v890_v52, %v2298_v11 }
 0x165   : > { %v932_v58 = vpack.c.bf16 %v917_v54, %v859_v55  ;;  %v920_v4 = vadd.f32 %v919_v56, %v891_v36 }
 0x167   : > { %940 = vst [vmem:[%s2307_s20 + $0x18] sm:$0xff] %v932_v58  ;;  %v995_v60 = vunpack.c.l.b16 %v932_v58  ;;  %v996_v62 = vunpack.c.h.b16 %v932_v58 }
 0x168   : > { %v832_v22 = vpop.f32.mrf.mxu2 }
 0x169   : > { %v833_v41 = vadd.f32 %v832_v22, %v2300_v13  ;;  %v861_v63 = vpop.f32.mrf.mxu3  ;;  %v1007_v0 = vpack.c.b16 %v995_v60, %v993_v19  ;;  %v1008_v2 = vpack.c.b16 %v996_v62, %v994_v61 }
 0x16a   : > { %v892_v3 = vpop.f32.mrf.mxu0 }
 0x16b   : > { %v862_v51 = vadd.f32 %v861_v63, %v833_v41  ;;  %1130 = vmatmul.bf16.gmra.mxu2 %v1007_v0  ;;  %1159 = vmatmul.bf16.gmra.mxu3 %v1008_v2  ;;  %v921_v6 = vpop.f32.mrf.mxu1  ;;  %v893_v9 = vadd.f32 %v892_v3, %v2298_v11 }
 0x16d   : > { %v933_v57 = vpack.c.bf16 %v920_v4, %v862_v51  ;;  %v922_v59 = vadd.f32 %v921_v6, %v893_v9 }
 0x16f   : > { %941 = vst [vmem:[%s2307_s20 + $0x20] sm:$0xff] %v933_v57  ;;  %v997_v15 = vunpack.c.l.b16 %v933_v57  ;;  %v998_v18 = vunpack.c.h.b16 %v933_v57 }
 0x170   : > { %v834_v53 = vpop.f32.mrf.mxu2 }
 0x171   : > { %v835_v5 = vadd.f32 %v834_v53, %v2300_v13  ;;  %v863_v10 = vpop.f32.mrf.mxu3 }
 0x172   : > { %v895_v12 = vpop.f32.mrf.mxu0 }
 0x173   : > { %v864_v8 = vadd.f32 %v863_v10, %v835_v5  ;;  %v896_v16 = vadd.f32 %v895_v12, %v2298_v11  ;;  %v924_v20 = vpop.f32.mrf.mxu1 }
 0x175   : > { %v934_v14 = vpack.c.bf16 %v922_v59, %v864_v8  ;;  %v925_v28 = vadd.f32 %v924_v20, %v896_v16 }
 0x177   : > { %942 = vst [vmem:[%s2307_s20 + $0x28] sm:$0xff] %v934_v14  ;;  %v999_v17 = vunpack.c.l.b16 %v934_v14  ;;  %v1000_v38 = vunpack.c.h.b16 %v934_v14 }
 0x178   : > { %v837_v43 = vpop.f32.mrf.mxu2 }
 0x179   : > { %v838_v23 = vadd.f32 %v837_v43, %v2300_v13  ;;  %v866_v24 = vpop.f32.mrf.mxu3  ;;  %v1009_v25 = vpack.c.b16 %v999_v17, %v997_v15  ;;  %v1010_v27 = vpack.c.b16 %v1000_v38, %v998_v18 }
 0x17a   : > { %v897_v30 = vpop.f32.mrf.mxu0 }
 0x17b   : > { %v867_v29 = vadd.f32 %v866_v24, %v838_v23  ;;  %1135 = vmatmul.bf16.gmra.mxu2 %v1009_v25  ;;  %1164 = vmatmul.bf16.gmra.mxu3 %v1010_v27  ;;  %v898_v32 = vadd.f32 %v897_v30, %v2298_v11  ;;  %v926_v35 = vpop.f32.mrf.mxu1 }
 0x17d   : > { %v935_v31 = vpack.c.bf16 %v925_v28, %v867_v29  ;;  %v927_v39 = vadd.f32 %v926_v35, %v898_v32 }
 0x17f   : > { %943 = vst [vmem:[%s2307_s20 + $0x30] sm:$0xff] %v935_v31  ;;  %v1001_v44 = vunpack.c.l.b16 %v935_v31  ;;  %v1002_v46 = vunpack.c.h.b16 %v935_v31 }
 0x180   : > { %v839_v33 = vpop.f32.mrf.mxu2 }
 0x181   : > { %v840_v34 = vadd.f32 %v839_v33, %v2300_v13  ;;  %v868_v37 = vpop.f32.mrf.mxu3 }
 0x183   : > { %v869_v40 = vadd.f32 %v868_v37, %v840_v34 }
 0x185   : > { %v936_v42 = vpack.c.bf16 %v927_v39, %v869_v40 }
 0x187   : > { %944 = vst [vmem:[%s2307_s20 + $0x38] sm:$0xff] %v936_v42  ;;  %v1003_v45 = vunpack.c.l.b16 %v936_v42  ;;  %v1004_v47 = vunpack.c.h.b16 %v936_v42 }
 0x189   : > { %v1011_v48 = vpack.c.b16 %v1003_v45, %v1001_v44  ;;  %v1012_v49 = vpack.c.b16 %v1004_v47, %v1002_v46 }
 0x18b   : > { %1140 = vmatmul.bf16.gmra.mxu2 %v1011_v48  ;;  %1169 = vmatmul.bf16.gmra.mxu3 %v1012_v49 }
 0x18c   : > { %1743 = shalt.err (!%p1740_p3)
}
 0x18d   : > { %s1780_s19 = smov 128   ;;  %s1781_s20 = smov 8   ;;  %v1683_v1 = vld [vmem:[%s2385_s6] ss:$0 sm:$0xff] }
 0x18e   : > { %1642 = dma.vmem_to_hbm [thread:$0]  (%p1865_p5), %s1211_s26, 1024, %s1213_s10, %s1192_s13, %s1780_s19, %s1780_s19, %s1781_s20  }
 0x18f   : > { %s2395_s0 = sshll.u32 %s2401_s24, 2 }
 0x190   : > { %s2356_s12 = scalar_lea.vmem %s2387_s8, %s2395_s0 }
 0x1de   : > { %v1126_v11 = vpop.f32.mrf.mxu2  ;;  %v1155_v13 = vpop.f32.mrf.mxu3 }
 0x1df   : > { %v1127_v21 = vadd.f32 %v1683_v1, %v1126_v11 }
 0x1e1   : > { %v1156_v52 = vadd.f32 %v1155_v13, %v1127_v21 }
 0x1e6   : > { %v1128_v7 = vpop.f32.mrf.mxu2  ;;  %v1157_v50 = vpop.f32.mrf.mxu3 }
 0x1e7   : > { %v1129_v26 = vadd.f32 %v1683_v1, %v1128_v7 }
 0x1e9   : > { %v1158_v54 = vadd.f32 %v1157_v50, %v1129_v26 }
 0x1eb   : > { %v1622_v55 = vpack.c.bf16 %v1158_v54, %v1156_v52 }
 0x1ed   : > { %1623 = vst [vmem:[%s2356_s12] sm:$0xff] %v1622_v55  }
 0x1ee   : > { %v1131_v56 = vpop.f32.mrf.mxu2  ;;  %v1160_v58 = vpop.f32.mrf.mxu3 }
 0x1ef   : > { %v1132_v19 = vadd.f32 %v1683_v1, %v1131_v56 }
 0x1f1   : > { %v1161_v62 = vadd.f32 %v1160_v58, %v1132_v19 }
 0x1f6   : > { %v1133_v36 = vpop.f32.mrf.mxu2  ;;  %v1162_v60 = vpop.f32.mrf.mxu3 }
 0x1f7   : > { %v1134_v61 = vadd.f32 %v1683_v1, %v1133_v36 }
 0x1f9   : > { %v1163_v22 = vadd.f32 %v1162_v60, %v1134_v61 }
 0x1fb   : > { %v1627_v41 = vpack.c.bf16 %v1163_v22, %v1161_v62 }
 0x1fd   : > { %1639 = vst [vmem:[%s2356_s12 + $0x8] sm:$0xff] %v1627_v41  }
 0x1fe   : > { %v1136_v63 = vpop.f32.mrf.mxu2  ;;  %v1165_v0 = vpop.f32.mrf.mxu3 }
 0x1ff   : > { %v1137_v2 = vadd.f32 %v1683_v1, %v1136_v63 }
 0x201   : > { %v1166_v57 = vadd.f32 %v1165_v0, %v1137_v2 }
 0x206   : > { %v1138_v3 = vpop.f32.mrf.mxu2  ;;  %v1167_v4 = vpop.f32.mrf.mxu3 }
 0x207   : > { %v1139_v51 = vadd.f32 %v1683_v1, %v1138_v3 }
 0x209   : > { %v1168_v6 = vadd.f32 %v1167_v4, %v1139_v51 }
 0x20b   : > { %v1632_v9 = vpack.c.bf16 %v1168_v6, %v1166_v57 }
 0x20d   : > { %1640 = vst [vmem:[%s2356_s12 + $0x10] sm:$0xff] %v1632_v9  }
 0x20e   : > { %v1141_v53 = vpop.f32.mrf.mxu2  ;;  %v1170_v5 = vpop.f32.mrf.mxu3 }
 0x20f   : > { %v1142_v10 = vadd.f32 %v1683_v1, %v1141_v53 }
 0x211   : > { %v1171_v14 = vadd.f32 %v1170_v5, %v1142_v10 }
 0x216   : > { %v1143_v12 = vpop.f32.mrf.mxu2  ;;  %v1172_v8 = vpop.f32.mrf.mxu3 }
 0x217   : > { %v1144_v59 = vadd.f32 %v1683_v1, %v1143_v12 }
 0x219   : > { %v1173_v15 = vadd.f32 %v1172_v8, %v1144_v59 }
 0x21b   : > { %v1637_v16 = vpack.c.bf16 %v1173_v15, %v1171_v14 }
 0x21d   : > { %1641 = vst [vmem:[%s2356_s12 + $0x18] sm:$0xff] %v1637_v16  }
 0x21e PF: > { %p1648_p4 = scmp.ge.s32.totalorder %s1778_s30, 2  ;;  %s1231_s15 = sand.u32 1, %s1766_s27  }
 0x21f   : > { %s1232_s24 = scalar_lea.sflag [#allocation3], %s1231_s15 }
 0x220   : > { %p1645_p5 = pnand %p1648_p4, %p1869_p6 }
 0x222   : > { %p1646_p7 = pneg %p1645_p5 }
 0x224   : > { %1761 = dma.done.wait (%p1646_p7), %s1232_s24, 1024  }
 0x225   : > { %1763 = vsyncadd (%p1646_p7), %s1232_s24, 4294966272  ;;  %p19_p8 = scmp.ge.s32.totalorder %s1852_s11, 4   ;;  %s2396_s27 = smov %s1770_s28 }
 0x226   : > { %s2397_s28 = smov %s1774_s29  ;;  %s2398_s29 = smov %s1863_s14 }
 0x227   : > { %s2399_s30 = smov %s1852_s11  ;;  %21 = sbr.rel (!%p19_p8) target bundleno = 6 (0x6), region = 95 }
 0x22c   :  { %1246 = vsyncpa [#allocation3], 1 }
 0x22d   :  { %1248 = vsyncpa [#allocation3 + $0x1], 1 }

</bundles_post_ra>
